<compile_context>
chip_gen: v7x
topology: tpu7x:2x2x1
jax: 0.10.0
libtpu: 0.0.40
codegen_flags: <defaults>
</compile_context>

<pallas_src>
from functools import partial

import jax
import jax.numpy as jnp
from jax.experimental import pallas as pl
from jax.experimental.pallas import tpu as pltpu

LANE = 128
SUBLANE = 8


def _pick_tile_rows(m, target_rows):
    """Largest legal row-tile: full array if it fits the target, else the
    biggest multiple-of-8 divisor of m that is <= target_rows."""
    if m <= target_rows:
        return m                       # full-dim block is always layout-legal
    t = target_rows - (target_rows % SUBLANE)
    for d in range(t, 0, -SUBLANE):    # multiples of 8 only (8,128 constraint)
        if m % d == 0:
            return d
    return m                           # fallback (unaligned row count)


# ---------------------------------------------------------------------------
# Elementwise gild kernel:
#   out = x + coef * sigmoid(scale * (error - mean)) * noise
# with coef = 0.1*gold, scale = temperature/(std+1e-8), mean = mean(error),
# all precomputed once and passed as a tiny SMEM scalar array.
# ---------------------------------------------------------------------------
def _gild_kernel(params_ref, x_ref, err_ref, noise_ref, out_ref):
    coef = params_ref[0]     # 0.1 * gold
    scale = params_ref[1]    # temperature / (std + 1e-8)
    mean = params_ref[2]     # mean(error)

    e = err_ref[...].astype(jnp.float32)
    mask = jax.nn.sigmoid(scale * (e - mean))
    enhancement = coef * mask * noise_ref[...].astype(jnp.float32)
    out_ref[...] = (x_ref[...].astype(jnp.float32) + enhancement).astype(out_ref.dtype)


# ---------------------------------------------------------------------------
# Wrapper
# ---------------------------------------------------------------------------
@partial(jax.jit, static_argnames=("temperature", "tile_rows_target"))
def golden_error(x, error, gold=0.5, seed=0, *, temperature=1.0, tile_rows_target=2048):
    assert x.shape == error.shape, "x and error must have the same shape"
    orig_shape = x.shape
    total = x.size
    assert total % LANE == 0, "lane-dense layout requires total elements % 128 == 0"
    m = total // LANE
    tile_rows = _pick_tile_rows(m, tile_rows_target)
    grid = (m // tile_rows,)

    # Native-dtype, copy-free views (reshape of contiguous data, no astype pass).
    xf = x.reshape(m, LANE)
    ef = error.reshape(m, LANE)

    # Global stats of `error` once, as an XLA reduction (HBM-roofline already),
    # two-pass style like torch.std (unbiased, ddof=1). Accumulate in f32.
    std = jnp.std(error, ddof=1, dtype=jnp.float32)
    mean = jnp.mean(error, dtype=jnp.float32)
    inv = 1.0 / (std + jnp.float32(1e-8))

    # randn_like(x) equivalent, streamed into the kernel in x's dtype.
    noise = jax.random.normal(jax.random.PRNGKey(seed), (m, LANE), dtype=xf.dtype)

    params = jnp.stack(
        [
            jnp.float32(0.1) * jnp.asarray(gold, jnp.float32),
            jnp.asarray(temperature, jnp.float32) * inv,
            mean,
        ]
    ).astype(jnp.float32)

    out = pl.pallas_call(
        _gild_kernel,
        out_shape=jax.ShapeDtypeStruct((m, LANE), x.dtype),
        grid_spec=pltpu.PrefetchScalarGridSpec(
            num_scalar_prefetch=0,
            grid=grid,
            in_specs=[
                pl.BlockSpec(memory_space=pltpu.MemorySpace.SMEM),   # [coef, scale, mean]
                pl.BlockSpec((tile_rows, LANE), lambda i: (i, 0)),   # x
                pl.BlockSpec((tile_rows, LANE), lambda i: (i, 0)),   # error
                pl.BlockSpec((tile_rows, LANE), lambda i: (i, 0)),   # noise
            ],
            out_specs=pl.BlockSpec((tile_rows, LANE), lambda i: (i, 0)),
        ),
        compiler_params=pltpu.CompilerParams(
            # independent tiles -> shard across both TCs on v7x; no-op on v5e/v6e
            dimension_semantics=("parallel",),
            # 4 streams x 2 buffers x 1 MiB tile ~= 8 MiB at the default target;
            # 32 MiB is safe on v5e/v6e (128 MiB phys) and v7x (64 MiB phys).
            vmem_limit_bytes=32 * 1024 * 1024,
        ),
    )(params, xf, ef, noise)

    return out.reshape(orig_shape)


if __name__ == "__main__":
    key = jax.random.PRNGKey(0)
    kx, ke = jax.random.split(key)
    # NCHW, small: batch=2, channels=4, spatial=16x16  ->  2048 elems = (16, 128)
    x = jax.random.normal(kx, (2, 4, 16, 16), dtype=jnp.float32)
    error = jax.random.normal(ke, (2, 4, 16, 16), dtype=jnp.float32)

    # deterministic parameter init per module __init__: gold=0.5, temperature=1.0
    out = golden_error(x, error, gold=0.5, seed=1234, temperature=1.0)
    out = jax.block_until_ready(out)

    assert out.shape == x.shape and out.dtype == x.dtype
    assert bool(jnp.all(jnp.isfinite(out)))
    # enhancement is 0.1 * gold * mask * noise with mask in (0,1) -> stays small
    assert float(jnp.max(jnp.abs(out - x))) < 1.0

    print("KERNEL_OK")
</pallas_src>

<mosaic_0001>
module attributes {stable_mosaic.version = 11 : i64} {
  func.func @_gild_kernel(%arg0: i32, %arg1: memref<3xf32, #tpu.memory_space<smem>>, %arg2: memref<16x128xf32, #tpu.memory_space<vmem>>, %arg3: memref<16x128xf32, #tpu.memory_space<vmem>>, %arg4: memref<16x128xf32, #tpu.memory_space<vmem>>, %arg5: memref<16x128xf32, #tpu.memory_space<vmem>>) attributes {dimension_semantics = [#tpu.dimension_semantics<parallel>], iteration_bounds = array<i64: 1>, scalar_prefetch = 0 : i64, scratch_operands = 0 : i64, tpu.core_type = #tpu.core_type<tc>, window_params = [{transform_indices = @transform_0, window_bounds = array<i64: 3>}, {transform_indices = @transform_1, window_bounds = array<i64: 16, 128>}, {transform_indices = @transform_2, window_bounds = array<i64: 16, 128>}, {transform_indices = @transform_3, window_bounds = array<i64: 16, 128>}, {transform_indices = @transform_4, window_bounds = array<i64: 16, 128>}]} {
    %c0 = arith.constant 0 : index
    %0 = memref.load %arg1[%c0] : memref<3xf32, #tpu.memory_space<smem>>
    %c1 = arith.constant 1 : index
    %1 = memref.load %arg1[%c1] : memref<3xf32, #tpu.memory_space<smem>>
    %c2 = arith.constant 2 : index
    %2 = memref.load %arg1[%c2] : memref<3xf32, #tpu.memory_space<smem>>
    %c0_0 = arith.constant 0 : index
    %c0_1 = arith.constant 0 : index
    %3 = vector.load %arg3[%c0_0, %c0_1] : memref<16x128xf32, #tpu.memory_space<vmem>>, vector<16x128xf32>
    %4 = vector.broadcast %2 : f32 to vector<16x128xf32>
    %5 = arith.subf %3, %4 : vector<16x128xf32>
    %6 = vector.broadcast %1 : f32 to vector<16x128xf32>
    %7 = arith.mulf %6, %5 : vector<16x128xf32>
    %8 = arith.negf %7 : vector<16x128xf32>
    %9 = math.exp %8 : vector<16x128xf32>
    %cst = arith.constant 1.000000e+00 : f32
    %10 = vector.broadcast %cst : f32 to vector<16x128xf32>
    %11 = arith.addf %10, %9 : vector<16x128xf32>
    %12 = arith.divf %10, %11 : vector<16x128xf32>
    %13 = vector.broadcast %0 : f32 to vector<16x128xf32>
    %14 = arith.mulf %13, %12 : vector<16x128xf32>
    %c0_2 = arith.constant 0 : index
    %c0_3 = arith.constant 0 : index
    %15 = vector.load %arg4[%c0_2, %c0_3] : memref<16x128xf32, #tpu.memory_space<vmem>>, vector<16x128xf32>
    %16 = arith.mulf %14, %15 : vector<16x128xf32>
    %c0_4 = arith.constant 0 : index
    %c0_5 = arith.constant 0 : index
    %17 = vector.load %arg2[%c0_4, %c0_5] : memref<16x128xf32, #tpu.memory_space<vmem>>, vector<16x128xf32>
    %18 = arith.addf %17, %16 : vector<16x128xf32>
    %c0_6 = arith.constant 0 : index
    %c0_7 = arith.constant 0 : index
    %19 = vector.load %arg5[%c0_6, %c0_7] : memref<16x128xf32, #tpu.memory_space<vmem>>, vector<16x128xf32>
    tpu.vector_store %arg5[%c0_6, %c0_7], %18 {strides = array<i32>} : memref<16x128xf32, #tpu.memory_space<vmem>>, vector<16x128xf32>,
    return
  }
  func.func @transform_0(%arg0: i32) -> i32 {
    %c0_i32 = arith.constant 0 : i32
    %c0_i32_0 = arith.constant 0 : i32
    return %c0_i32 : i32
  }
  func.func @transform_1(%arg0: i32) -> (i32, i32) {
    %c0_i32 = arith.constant 0 : i32
    %c0_i32_0 = arith.constant 0 : i32
    return %arg0, %c0_i32 : i32, i32
  }
  func.func @transform_2(%arg0: i32) -> (i32, i32) {
    %c0_i32 = arith.constant 0 : i32
    %c0_i32_0 = arith.constant 0 : i32
    return %arg0, %c0_i32 : i32, i32
  }
  func.func @transform_3(%arg0: i32) -> (i32, i32) {
    %c0_i32 = arith.constant 0 : i32
    %c0_i32_0 = arith.constant 0 : i32
    return %arg0, %c0_i32 : i32, i32
  }
  func.func @transform_4(%arg0: i32) -> (i32, i32) {
    %c0_i32 = arith.constant 0 : i32
    %c0_i32_0 = arith.constant 0 : i32
    return %arg0, %c0_i32 : i32, i32
  }
}

</mosaic_0001>

<bundles_post_ra>
// kernel: golden_error.1
= control target key start
LH: loop header
LB: loop body
LE: loop exit
PB: predicated region body
PF: predicated region fallthrough
CT: control target
= control target key end

     0   :  { %9 = vsyncpa [#allocation3], 0  ;;  %s151_s0 = inlined_call_operand.vmem [shape: f32[3], index: 0, kind: input, shape index: {}]   ;;  %s152_s1 = inlined_call_operand.vmem [shape: f32[16,128], index: 1, kind: input, shape index: {}]   ;;  %s153_s2 = inlined_call_operand.vmem [shape: f32[16,128], index: 2, kind: input, shape index: {}]   ;;  %s154_s3 = inlined_call_operand.vmem [shape: f32[16,128], index: 3, kind: input, shape index: {}]   ;;  %s155_s4 = inlined_call_operand.vmem [shape: f32[16,128], index: 4, kind: output, shape index: {}]  }
   0x1   :  { %s16_s17 = sshll.u32 %s151_s0, 4  ;;  %s17_s17 = int_to_ptr.vmem [resolvable:$true] %s16_s17 }
   0x2   :  { %s84_s18 = scalar_lea.vmem %s17_s17, 16  ;;  %p89_p1 = scmp.lt.s32.totalorder %s17_s17, %s17_s17 }
   0x3   :  { %p85_p0 = scmp.ne.s32.totalorder %s17_s17, %s84_s18  ;;  %p90_p2 = scmp.lt.s32.totalorder %s84_s18, %s84_s18 }
   0x5   :  { %p91_p3 = por %p90_p2, %p89_p1 }
   0x7   :  { %p92_p4 = pnand %p91_p3, %p85_p0 }
   0x9   :  { %95 = shalt.err (!%p92_p4)
}
   0xa   :  { %s98_s19 = smov [#allocation2]  }
   0xb   :  { %19 = dma.vmem_to_smem %s17_s17, 16, %s98_s19, [#allocation3]  }
   0xc   :  { %96 = dma.done.wait [#allocation3], 16  }
   0xd   :  { %97 = vsyncadd [#allocation3], 4294967280 }
   0xe   :  { %29 = sfence }
   0xf   :  { %s71_s20 = sld [smem:[#allocation2 + $0x1]]  ;;  %s72_s21 = sld [smem:[#allocation2 + $0x2]]  ;;  %v33_v0 = vld [vmem:[%s153_s2] sm:$0xff]  ;;  %v34_v1 = vld [vmem:[%s153_s2 + $0x8] sm:$0xff] }
  0x10   :  { %s30_s25 = sld [smem:[#allocation2]]  ;;  %v56_v16 = vld [vmem:[%s154_s3] sm:$0xff]  ;;  %v57_v19 = vld [vmem:[%s154_s3 + $0x8] sm:$0xff] }
  0x11   :  { %v60_v20 = vld [vmem:[%s152_s1] sm:$0xff]  ;;  %v61_v23 = vld [vmem:[%s152_s1 + $0x8] sm:$0xff] }
  0x15   :  { %v35_v2 = vstv %s72_s21  ;;  %v38_v3 = vstv %s71_s20 }
  0x16   :  { %v36_v4 = vsub.f32 %v33_v0, %v35_v2  ;;  %v37_v5 = vsub.f32 %v34_v1, %v35_v2  ;;  %v53_v14 = vstv %s30_s25 }
  0x18   :  { %v39_v6 = vmul.f32 %v38_v3, %v36_v4  ;;  %v40_v7 = vmul.f32 %v38_v3, %v37_v5 }
  0x1a   :  { %v73_v8 = vmul.f32 -1.442695, %v39_v6  ;;  %v74_v9 = vmul.f32 -1.442695, %v40_v7 }
  0x1c   :  { %76 = vpow2.f32 %v73_v8 }
  0x1d   :  { %78 = vpow2.f32 %v74_v9 }
  0x26   :  { %v77_v10 = vpop.eup %76 }
  0x27   :  { %v79_v11 = vpop.eup %78  ;;  %v47_v12 = vadd.f32 1.0, %v77_v10 }
  0x28   :  { %v48_v13 = vadd.f32 1.0, %v79_v11 }
  0x29   :  { %80 = vrcp.f32 %v47_v12 }
  0x2a   :  { %82 = vrcp.f32 %v48_v13 }
  0x33   :  { %v81_v15 = vpop.eup %80 }
  0x34   :  { %v83_v17 = vpop.eup %82  ;;  %v54_v18 = vmul.f32 %v81_v15, %v53_v14 }
  0x35   :  { %v55_v21 = vmul.f32 %v83_v17, %v53_v14 }
  0x36   :  { %v58_v22 = vmul.f32 %v56_v16, %v54_v18 }
  0x37   :  { %v59_v24 = vmul.f32 %v57_v19, %v55_v21 }
  0x38   :  { %v62_v25 = vadd.f32 %v60_v20, %v58_v22 }
  0x39   :  { %v63_v26 = vadd.f32 %v61_v23, %v59_v24 }
  0x3a   :  { %64 = vst [vmem:[%s155_s4] sm:$0xff] %v62_v25 }
  0x3b   :  { %65 = vst [vmem:[%s155_s4 + $0x8] sm:$0xff] %v63_v26 }
  0x3c   :  { %70 = vsyncpa [#allocation3], 1 }

</bundles_post_ra>
